<compile_context>
chip_gen: v6e
topology: v6e:2x2x1
jax: 0.10.0
libtpu: 0.0.40
codegen_flags: <defaults>
</compile_context>

<pallas_src>
import functools

import jax
import jax.numpy as jnp
from jax import lax
from jax.experimental import pallas as pl
from jax.experimental.pallas import tpu as pltpu


def _log_sigmoid(x):
    # numerically stable log(sigmoid(x)) = min(x, 0) - log1p(exp(-|x|))
    return jnp.minimum(x, 0.0) - jnp.log1p(jnp.exp(-jnp.abs(x)))


def _round_up(x, m):
    return ((x + m - 1) // m) * m


def _default_core_splits():
    # v5e / v6e have a single TensorCore per chip, so a core-split grid axis is
    # pure overhead there.  v4 / v5p (megacore) and v7x expose two TensorCores
    # that a "parallel" grid axis can be sharded across.
    try:
        kind = jax.devices()[0].device_kind.lower()
    except Exception:
        return 1
    single_core = any(tag in kind for tag in
                      ("v5e", "v5 lite", "v5lite", "v6e", "v6 lite", "v6lite"))
    return 1 if single_core else 2


def _skipgram_kernel(pos_ref, neg_ref, ctx_ref, acc_ref, *,
                     tb, n_neg, n_valid, apply_mask):
    """One grid step: a tile of `tb` batch rows for one core split.

    pos_ref: (tb, d)         squeezed positive embeddings (sublane-dense)
    neg_ref: (tb, n_neg*d)   flattened negative samples  (sublane-dense)
    ctx_ref: (tb, C, d)      context embeddings
    acc_ref: (1, C, tb)      resident per-core partial-score accumulator,
                             lane-dense layout (batch on lanes).
    """
    c = pl.program_id(0)          # core-split axis ("parallel")
    b = pl.program_id(1)          # batch-tile axis ("arbitrary", accumulating)
    nb = pl.num_programs(1)
    d = pos_ref.shape[-1]

    @pl.when(b == 0)
    def _():
        acc_ref[...] = jnp.zeros_like(acc_ref)

    pos_v = pos_ref[...].astype(jnp.float32)   # (tb, d)
    ctx_v = ctx_ref[...].astype(jnp.float32)   # (tb, C, d)

    # Positive scores: <pos_i, ctx_ij> over d (VPU multiply + lane reduce),
    # transposed to the lane-dense (C, tb) layout BEFORE the EUP-heavy
    # log-sigmoid chain so exp/log1p/min/add run at full lane occupancy.
    dot_pos = jnp.sum(pos_v[:, None, :] * ctx_v, axis=-1)     # (tb, C)
    partial = _log_sigmoid(dot_pos.T)                          # (C, tb)

    # Negative scores: unrolled over the small static number of samples.
    # Sample k is a static lane slice of the flattened neg block (no strided /
    # padded sublane access, no MXU, no explicit 3-D transpose).
    for k in range(n_neg):
        neg_k = neg_ref[:, k * d:(k + 1) * d].astype(jnp.float32)   # (tb, d)
        dot_k = jnp.sum(neg_k[:, None, :] * ctx_v, axis=-1)         # (tb, C)
        partial = partial + _log_sigmoid(-dot_k.T)                   # (C, tb)

    if apply_mask:
        # Only the tail tile(s) pay for the padded-row mask.
        row0 = (c * nb + b) * tb
        is_tail = row0 + tb > n_valid

        @pl.when(jnp.logical_not(is_tail))
        def _():
            acc_ref[...] += partial[None, :, :]

        @pl.when(is_tail)
        def _():
            col = row0 + lax.broadcasted_iota(jnp.int32, (1, tb), 1)
            mask = (col < n_valid).astype(jnp.float32)               # (1, tb)
            acc_ref[...] += (partial * mask)[None, :, :]
    else:
        acc_ref[...] += partial[None, :, :]


def skipgram_loss(pos, neg, ctx, *, batch_tile=None, num_core_splits=None):
    n, one, d = pos.shape
    assert one == 1
    _, n_neg, _ = neg.shape
    _, c_dim, _ = ctx.shape
    n_elem = n * c_dim + n * n_neg * c_dim   # score_pos.size + score_neg.size

    nc = (_default_core_splits() if num_core_splits is None
          else max(1, int(num_core_splits)))

    if batch_tile is None:
        per_core = pl.cdiv(n, nc)
        if per_core >= 128:
            # Lane-dense accumulator / unmasked stores want tb % 128 == 0;
            # 512 rows keeps the double-buffered working set comfortably under
            # every generation's VMEM budget (v5e 16 MiB default scoped,
            # v7x 64 MiB physical).
            tb = min(512, _round_up(per_core, 128))
        else:
            tb = _round_up(per_core, 8)
    else:
        tb = _round_up(int(batch_tile), 8)

    n_pad = _round_up(n, tb * nc)
    apply_mask = n_pad != n
    if apply_mask:
        pad3 = ((0, n_pad - n), (0, 0), (0, 0))
        pos = jnp.pad(pos, pad3)
        neg = jnp.pad(neg, pad3)
        ctx = jnp.pad(ctx, pad3)
    nb = n_pad // (tb * nc)   # batch tiles per core split

    # Free, contiguous reshapes: drop pos's singleton dim and flatten neg's
    # sample dim into lanes so both blocks are 2-D sublane-dense.
    pos2 = pos.reshape(n_pad, d)
    neg2 = neg.reshape(n_pad, n_neg * d)

    # Scoped-VMEM request sized from the actual padded block footprint:
    # double-buffered inputs + resident accumulator + headroom for the fused
    # broadcast-multiply / reduce temporaries.
    def _tile_bytes(rows, cols):
        return _round_up(rows, 8) * _round_up(cols, 128) * 4

    in_block = (_tile_bytes(tb, d)
                + _tile_bytes(tb, n_neg * d)
                + tb * _tile_bytes(c_dim, d))
    acc_block = _tile_bytes(c_dim, tb)
    vmem_limit = (2 * in_block + acc_block
                  + 2 * tb * _tile_bytes(c_dim, d) + (8 << 20))
    vmem_limit = int(min(max(vmem_limit, 16 << 20), 48 << 20))

    kernel = functools.partial(
        _skipgram_kernel,
        tb=tb, n_neg=n_neg, n_valid=n, apply_mask=apply_mask)

    # Per-core partial-score accumulators in lane-dense (C, tb) layout.
    partials = pl.pallas_call(
        kernel,
        out_shape=jax.ShapeDtypeStruct((nc, c_dim, tb), jnp.float32),
        grid_spec=pltpu.PrefetchScalarGridSpec(
            num_scalar_prefetch=0,
            grid=(nc, nb),
            in_specs=[
                pl.BlockSpec((tb, d), lambda c, b: (c * nb + b, 0)),
                pl.BlockSpec((tb, n_neg * d), lambda c, b: (c * nb + b, 0)),
                pl.BlockSpec((tb, c_dim, d), lambda c, b: (c * nb + b, 0, 0)),
            ],
            out_specs=pl.BlockSpec((1, c_dim, tb), lambda c, b: (c, 0, 0)),
        ),
        compiler_params=pltpu.CompilerParams(
            # Core-split axis is parallel (both TCs on v7x / megacore chips);
            # batch-tile axis accumulates into a resident block -> arbitrary.
            # TODO(synk): on v7x verify in the profile that the leading axis
            # lands on both TensorCores; if not, switch it to CORE_PARALLEL /
            # pl.core_map over a tensorcore mesh.
            dimension_semantics=("parallel", "arbitrary"),
            vmem_limit_bytes=vmem_limit,
        ),
    )(pos2, neg2, ctx)

    # Single final reduction + normalization (true element count, not padded).
    return -jnp.sum(partials) / n_elem


def skipgram_loss_ref(pos, neg, ctx):
    dot_pos = jnp.sum(pos * ctx, axis=-1)
    score_pos = _log_sigmoid(dot_pos)
    dot_neg = jnp.einsum("nkd,ncd->nkc", neg, ctx)
    score_neg = _log_sigmoid(-dot_neg)
    n_elem = score_pos.size + score_neg.size
    return -(jnp.sum(score_pos) + jnp.sum(score_neg)) / n_elem


if __name__ == "__main__":
    def make_inputs(key, n, n_neg, size_win, d):
        k1, k2, k3 = jax.random.split(key, 3)
        pos = jax.random.normal(k1, (n, 1, d), dtype=jnp.float32)
        neg = jax.random.normal(k2, (n, n_neg, d), dtype=jnp.float32)
        ctx = jax.random.normal(k3, (n, 2 * size_win, d), dtype=jnp.float32)
        return pos, neg, ctx

    root = jax.random.PRNGKey(0)
    k_a, k_b, k_c, k_d = jax.random.split(root, 4)

    # config 1: default tiling, batch needs padding (exercises the row mask)
    pos, neg, ctx = make_inputs(k_a, 10, 4, 4, 32)
    loss = jax.block_until_ready(skipgram_loss(pos, neg, ctx))
    loss_ref = jax.block_until_ready(skipgram_loss_ref(pos, neg, ctx))
    assert jnp.allclose(loss, loss_ref, rtol=1e-4, atol=1e-5), (loss, loss_ref)

    # config 2: forced small tile -> multi-step accumulation + padded tail tile
    pos, neg, ctx = make_inputs(k_b, 40, 4, 4, 32)
    loss = jax.block_until_ready(
        skipgram_loss(pos, neg, ctx, batch_tile=8, num_core_splits=1))
    loss_ref = jax.block_until_ready(skipgram_loss_ref(pos, neg, ctx))
    assert jnp.allclose(loss, loss_ref, rtol=1e-4, atol=1e-5), (loss, loss_ref)

    # config 3: exact tiling, no padding / no mask path, forced 2-way core split
    # (serial-but-correct loop on single-core chips)
    pos, neg, ctx = make_inputs(k_c, 32, 4, 4, 32)
    loss = jax.block_until_ready(
        skipgram_loss(pos, neg, ctx, batch_tile=8, num_core_splits=2))
    loss_ref = jax.block_until_ready(skipgram_loss_ref(pos, neg, ctx))
    assert jnp.allclose(loss, loss_ref, rtol=1e-4, atol=1e-5), (loss, loss_ref)

    # config 4: lane-dense fast path (tb multiple of 128, d multiple of 128)
    pos, neg, ctx = make_inputs(k_d, 256, 4, 4, 128)
    loss = jax.block_until_ready(skipgram_loss(pos, neg, ctx))
    loss_ref = jax.block_until_ready(skipgram_loss_ref(pos, neg, ctx))
    assert jnp.allclose(loss, loss_ref, rtol=1e-4, atol=1e-5), (loss, loss_ref)

    print("KERNEL_OK")
</pallas_src>

<mosaic_0001>
module attributes {stable_mosaic.version = 11 : i64} {
  func.func @_skipgram_kernel(%arg0: i32, %arg1: i32, %arg2: memref<8x32xf32, #tpu.memory_space<vmem>>, %arg3: memref<8x128xf32, #tpu.memory_space<vmem>>, %arg4: memref<8x8x32xf32, #tpu.memory_space<vmem>>, %arg5: memref<1x8x8xf32, #tpu.memory_space<vmem>>) attributes {dimension_semantics = [#tpu.dimension_semantics<parallel>, #tpu.dimension_semantics<arbitrary>], iteration_bounds = array<i64: 2, 1>, scalar_prefetch = 0 : i64, scratch_operands = 0 : i64, tpu.core_type = #tpu.core_type<tc>, window_params = [{transform_indices = @transform_0, window_bounds = array<i64: 8, 32>}, {transform_indices = @transform_1, window_bounds = array<i64: 8, 128>}, {transform_indices = @transform_2, window_bounds = array<i64: 8, 8, 32>}, {transform_indices = @transform_3, window_bounds = array<i64: 1, 8, 8>}]} {
    %c0_i32 = arith.constant 0 : i32
    %0 = arith.cmpi eq, %arg1, %c0_i32 : i32
    %1 = arith.extui %0 : i1 to i32
    %c0_i32_0 = arith.constant 0 : i32
    %2 = arith.cmpi ne, %1, %c0_i32_0 : i32
    scf.if %2 {
      %cst_31 = arith.constant 0.000000e+00 : f32
      %96 = vector.broadcast %cst_31 : f32 to vector<1x8x8xf32>
      %c0_32 = arith.constant 0 : index
      %c0_33 = arith.constant 0 : index
      %c0_34 = arith.constant 0 : index
      %97 = vector.load %arg5[%c0_32, %c0_33, %c0_34] : memref<1x8x8xf32, #tpu.memory_space<vmem>>, vector<1x8x8xf32>
      tpu.vector_store %arg5[%c0_32, %c0_33, %c0_34], %96 {strides = array<i32>} : memref<1x8x8xf32, #tpu.memory_space<vmem>>, vector<1x8x8xf32>,
    } else {
    }
    %c0 = arith.constant 0 : index
    %c0_1 = arith.constant 0 : index
    %3 = vector.load %arg2[%c0, %c0_1] : memref<8x32xf32, #tpu.memory_space<vmem>>, vector<8x32xf32>
    %c0_2 = arith.constant 0 : index
    %c0_3 = arith.constant 0 : index
    %c0_4 = arith.constant 0 : index
    %4 = vector.load %arg4[%c0_2, %c0_3, %c0_4] : memref<8x8x32xf32, #tpu.memory_space<vmem>>, vector<8x8x32xf32>
    %5 = vector.shape_cast %3 : vector<8x32xf32> to vector<8x1x32xf32>
    %6 = vector.broadcast %5 : vector<8x1x32xf32> to vector<8x8x32xf32>
    %7 = arith.mulf %6, %4 : vector<8x8x32xf32>
    %cst = arith.constant dense<0.000000e+00> : vector<8x8xf32>
    %8 = vector.multi_reduction <add>, %7, %cst [2] : vector<8x8x32xf32> to vector<8x8xf32>
    %9 = tpu.transpose %8, [1, 0] : vector<8x8xf32> -> vector<8x8xf32>
    %cst_5 = arith.constant 0.000000e+00 : f32
    %10 = vector.broadcast %cst_5 : f32 to vector<8x8xf32>
    %11 = arith.minimumf %9, %10 : vector<8x8xf32>
    %12 = math.absf %9 : vector<8x8xf32>
    %cst_6 = arith.constant 0.000000e+00 : f32
    %13 = vector.broadcast %cst_6 : f32 to vector<8x8xf32>
    %14 = arith.subf %13, %12 : vector<8x8xf32>
    %15 = math.exp %14 : vector<8x8xf32>
    %16 = math.log1p %15 : vector<8x8xf32>
    %17 = arith.subf %11, %16 : vector<8x8xf32>
    %c0_7 = arith.constant 0 : index
    %c0_8 = arith.constant 0 : index
    %18 = vector.load %arg3[%c0_7, %c0_8] : memref<8x128xf32, #tpu.memory_space<vmem>>, vector<8x32xf32>
    %19 = vector.shape_cast %18 : vector<8x32xf32> to vector<8x1x32xf32>
    %20 = vector.broadcast %19 : vector<8x1x32xf32> to vector<8x8x32xf32>
    %21 = arith.mulf %20, %4 : vector<8x8x32xf32>
    %cst_9 = arith.constant dense<0.000000e+00> : vector<8x8xf32>
    %22 = vector.multi_reduction <add>, %21, %cst_9 [2] : vector<8x8x32xf32> to vector<8x8xf32>
    %23 = tpu.transpose %22, [1, 0] : vector<8x8xf32> -> vector<8x8xf32>
    %cst_10 = arith.constant 0.000000e+00 : f32
    %24 = vector.broadcast %cst_10 : f32 to vector<8x8xf32>
    %25 = arith.subf %24, %23 : vector<8x8xf32>
    %cst_11 = arith.constant 0.000000e+00 : f32
    %26 = vector.broadcast %cst_11 : f32 to vector<8x8xf32>
    %27 = arith.minimumf %25, %26 : vector<8x8xf32>
    %28 = math.absf %25 : vector<8x8xf32>
    %cst_12 = arith.constant 0.000000e+00 : f32
    %29 = vector.broadcast %cst_12 : f32 to vector<8x8xf32>
    %30 = arith.subf %29, %28 : vector<8x8xf32>
    %31 = math.exp %30 : vector<8x8xf32>
    %32 = math.log1p %31 : vector<8x8xf32>
    %33 = arith.subf %27, %32 : vector<8x8xf32>
    %34 = arith.addf %17, %33 : vector<8x8xf32>
    %c0_13 = arith.constant 0 : index
    %c32 = arith.constant 32 : index
    %35 = vector.load %arg3[%c0_13, %c32] : memref<8x128xf32, #tpu.memory_space<vmem>>, vector<8x32xf32>
    %36 = vector.shape_cast %35 : vector<8x32xf32> to vector<8x1x32xf32>
    %37 = vector.broadcast %36 : vector<8x1x32xf32> to vector<8x8x32xf32>
    %38 = arith.mulf %37, %4 : vector<8x8x32xf32>
    %cst_14 = arith.constant dense<0.000000e+00> : vector<8x8xf32>
    %39 = vector.multi_reduction <add>, %38, %cst_14 [2] : vector<8x8x32xf32> to vector<8x8xf32>
    %40 = tpu.transpose %39, [1, 0] : vector<8x8xf32> -> vector<8x8xf32>
    %cst_15 = arith.constant 0.000000e+00 : f32
    %41 = vector.broadcast %cst_15 : f32 to vector<8x8xf32>
    %42 = arith.subf %41, %40 : vector<8x8xf32>
    %cst_16 = arith.constant 0.000000e+00 : f32
    %43 = vector.broadcast %cst_16 : f32 to vector<8x8xf32>
    %44 = arith.minimumf %42, %43 : vector<8x8xf32>
    %45 = math.absf %42 : vector<8x8xf32>
    %cst_17 = arith.constant 0.000000e+00 : f32
    %46 = vector.broadcast %cst_17 : f32 to vector<8x8xf32>
    %47 = arith.subf %46, %45 : vector<8x8xf32>
    %48 = math.exp %47 : vector<8x8xf32>
    %49 = math.log1p %48 : vector<8x8xf32>
    %50 = arith.subf %44, %49 : vector<8x8xf32>
    %51 = arith.addf %34, %50 : vector<8x8xf32>
    %c0_18 = arith.constant 0 : index
    %c64 = arith.constant 64 : index
    %52 = vector.load %arg3[%c0_18, %c64] : memref<8x128xf32, #tpu.memory_space<vmem>>, vector<8x32xf32>
    %53 = vector.shape_cast %52 : vector<8x32xf32> to vector<8x1x32xf32>
    %54 = vector.broadcast %53 : vector<8x1x32xf32> to vector<8x8x32xf32>
    %55 = arith.mulf %54, %4 : vector<8x8x32xf32>
    %cst_19 = arith.constant dense<0.000000e+00> : vector<8x8xf32>
    %56 = vector.multi_reduction <add>, %55, %cst_19 [2] : vector<8x8x32xf32> to vector<8x8xf32>
    %57 = tpu.transpose %56, [1, 0] : vector<8x8xf32> -> vector<8x8xf32>
    %cst_20 = arith.constant 0.000000e+00 : f32
    %58 = vector.broadcast %cst_20 : f32 to vector<8x8xf32>
    %59 = arith.subf %58, %57 : vector<8x8xf32>
    %cst_21 = arith.constant 0.000000e+00 : f32
    %60 = vector.broadcast %cst_21 : f32 to vector<8x8xf32>
    %61 = arith.minimumf %59, %60 : vector<8x8xf32>
    %62 = math.absf %59 : vector<8x8xf32>
    %cst_22 = arith.constant 0.000000e+00 : f32
    %63 = vector.broadcast %cst_22 : f32 to vector<8x8xf32>
    %64 = arith.subf %63, %62 : vector<8x8xf32>
    %65 = math.exp %64 : vector<8x8xf32>
    %66 = math.log1p %65 : vector<8x8xf32>
    %67 = arith.subf %61, %66 : vector<8x8xf32>
    %68 = arith.addf %51, %67 : vector<8x8xf32>
    %c0_23 = arith.constant 0 : index
    %c96 = arith.constant 96 : index
    %69 = vector.load %arg3[%c0_23, %c96] : memref<8x128xf32, #tpu.memory_space<vmem>>, vector<8x32xf32>
    %70 = vector.shape_cast %69 : vector<8x32xf32> to vector<8x1x32xf32>
    %71 = vector.broadcast %70 : vector<8x1x32xf32> to vector<8x8x32xf32>
    %72 = arith.mulf %71, %4 : vector<8x8x32xf32>
    %cst_24 = arith.constant dense<0.000000e+00> : vector<8x8xf32>
    %73 = vector.multi_reduction <add>, %72, %cst_24 [2] : vector<8x8x32xf32> to vector<8x8xf32>
    %74 = tpu.transpose %73, [1, 0] : vector<8x8xf32> -> vector<8x8xf32>
    %cst_25 = arith.constant 0.000000e+00 : f32
    %75 = vector.broadcast %cst_25 : f32 to vector<8x8xf32>
    %76 = arith.subf %75, %74 : vector<8x8xf32>
    %cst_26 = arith.constant 0.000000e+00 : f32
    %77 = vector.broadcast %cst_26 : f32 to vector<8x8xf32>
    %78 = arith.minimumf %76, %77 : vector<8x8xf32>
    %79 = math.absf %76 : vector<8x8xf32>
    %cst_27 = arith.constant 0.000000e+00 : f32
    %80 = vector.broadcast %cst_27 : f32 to vector<8x8xf32>
    %81 = arith.subf %80, %79 : vector<8x8xf32>
    %82 = math.exp %81 : vector<8x8xf32>
    %83 = math.log1p %82 : vector<8x8xf32>
    %84 = arith.subf %78, %83 : vector<8x8xf32>
    %85 = arith.addf %68, %84 : vector<8x8xf32>
    %c1_i32 = arith.constant 1 : i32
    %86 = arith.muli %arg0, %c1_i32 : i32
    %87 = arith.addi %86, %arg1 : i32
    %c8_i32 = arith.constant 8 : i32
    %88 = arith.muli %87, %c8_i32 : i32
    %c8_i32_28 = arith.constant 8 : i32
    %89 = arith.addi %88, %c8_i32_28 : i32
    %c10_i32 = arith.constant 10 : i32
    %90 = arith.cmpi sgt, %89, %c10_i32 : i32
    %true = arith.constant true
    %91 = arith.xori %90, %true : i1
    %92 = arith.extui %91 : i1 to i32
    %c0_i32_29 = arith.constant 0 : i32
    %93 = arith.cmpi ne, %92, %c0_i32_29 : i32
    scf.if %93 {
      %c0_31 = arith.constant 0 : index
      %c0_32 = arith.constant 0 : index
      %c0_33 = arith.constant 0 : index
      %96 = vector.load %arg5[%c0_31, %c0_32, %c0_33] : memref<1x8x8xf32, #tpu.memory_space<vmem>>, vector<1x8x8xf32>
      %97 = vector.shape_cast %85 : vector<8x8xf32> to vector<1x8x8xf32>
      %98 = arith.addf %96, %97 : vector<1x8x8xf32>
      %c0_34 = arith.constant 0 : index
      %c0_35 = arith.constant 0 : index
      %c0_36 = arith.constant 0 : index
      %99 = vector.load %arg5[%c0_34, %c0_35, %c0_36] : memref<1x8x8xf32, #tpu.memory_space<vmem>>, vector<1x8x8xf32>
      tpu.vector_store %arg5[%c0_34, %c0_35, %c0_36], %98 {strides = array<i32>} : memref<1x8x8xf32, #tpu.memory_space<vmem>>, vector<1x8x8xf32>,
    } else {
    }
    %94 = arith.extui %90 : i1 to i32
    %c0_i32_30 = arith.constant 0 : i32
    %95 = arith.cmpi ne, %94, %c0_i32_30 : i32
    scf.if %95 {
      %96 = tpu.iota {dimensions = array<i32: 1>} : vector<1x8xi32>
      %97 = vector.broadcast %88 : i32 to vector<1x8xi32>
      %98 = arith.addi %97, %96 : vector<1x8xi32>
      %c10_i32_31 = arith.constant 10 : i32
      %99 = vector.broadcast %c10_i32_31 : i32 to vector<1x8xi32>
      %100 = arith.cmpi slt, %98, %99 : vector<1x8xi32>
      %101 = arith.extui %100 : vector<1x8xi1> to vector<1x8xi32>
      %102 = arith.sitofp %101 : vector<1x8xi32> to vector<1x8xf32>
      %c0_32 = arith.constant 0 : index
      %c0_33 = arith.constant 0 : index
      %c0_34 = arith.constant 0 : index
      %103 = vector.load %arg5[%c0_32, %c0_33, %c0_34] : memref<1x8x8xf32, #tpu.memory_space<vmem>>, vector<1x8x8xf32>
      %104 = vector.broadcast %102 : vector<1x8xf32> to vector<8x8xf32>
      %105 = arith.mulf %85, %104 : vector<8x8xf32>
      %106 = vector.shape_cast %105 : vector<8x8xf32> to vector<1x8x8xf32>
      %107 = arith.addf %103, %106 : vector<1x8x8xf32>
      %c0_35 = arith.constant 0 : index
      %c0_36 = arith.constant 0 : index
      %c0_37 = arith.constant 0 : index
      %108 = vector.load %arg5[%c0_35, %c0_36, %c0_37] : memref<1x8x8xf32, #tpu.memory_space<vmem>>, vector<1x8x8xf32>
      tpu.vector_store %arg5[%c0_35, %c0_36, %c0_37], %107 {strides = array<i32>} : memref<1x8x8xf32, #tpu.memory_space<vmem>>, vector<1x8x8xf32>,
    } else {
    }
    return
  }
  func.func @transform_0(%arg0: i32, %arg1: i32) -> (i32, i32) {
    %c1_i32 = arith.constant 1 : i32
    %0 = arith.muli %arg0, %c1_i32 : i32
    %1 = arith.addi %0, %arg1 : i32
    %c0_i32 = arith.constant 0 : i32
    %c0_i32_0 = arith.constant 0 : i32
    return %1, %c0_i32 : i32, i32
  }
  func.func @transform_1(%arg0: i32, %arg1: i32) -> (i32, i32) {
    %c1_i32 = arith.constant 1 : i32
    %0 = arith.muli %arg0, %c1_i32 : i32
    %1 = arith.addi %0, %arg1 : i32
    %c0_i32 = arith.constant 0 : i32
    %c0_i32_0 = arith.constant 0 : i32
    return %1, %c0_i32 : i32, i32
  }
  func.func @transform_2(%arg0: i32, %arg1: i32) -> (i32, i32, i32) {
    %c1_i32 = arith.constant 1 : i32
    %0 = arith.muli %arg0, %c1_i32 : i32
    %1 = arith.addi %0, %arg1 : i32
    %c0_i32 = arith.constant 0 : i32
    %c0_i32_0 = arith.constant 0 : i32
    %c0_i32_1 = arith.constant 0 : i32
    return %1, %c0_i32, %c0_i32_0 : i32, i32, i32
  }
  func.func @transform_3(%arg0: i32, %arg1: i32) -> (i32, i32, i32) {
    %c0_i32 = arith.constant 0 : i32
    %c0_i32_0 = arith.constant 0 : i32
    %c0_i32_1 = arith.constant 0 : i32
    return %arg0, %c0_i32, %c0_i32_0 : i32, i32, i32
  }
}

</mosaic_0001>

<bundles_post_ra>
// kernel: tpu_custom_call.1
= control target key start
LH: loop header
LB: loop body
LE: loop exit
PB: predicated region body
PF: predicated region fallthrough
CT: control target
= control target key end

     0   :  { %s2663_s0 = inlined_call_operand.hbm [shape: f32[16,32], index: 0, kind: input, shape index: {}]   ;;  %s2664_s1 = inlined_call_operand.hbm [shape: f32[16,128], index: 1, kind: input, shape index: {}]   ;;  %s2665_s2 = inlined_call_operand.hbm [shape: f32[16,8,32], index: 2, kind: input, shape index: {}]   ;;  %s2666_s3 = inlined_call_operand.hbm [shape: f32[2,8,8], index: 3, kind: output, shape index: {}]  }
   0x1   :  { %2669 = sst [smem:[#allocation15_spill]] %s2664_s1 }
   0x2   :  { %8 = vsyncpa [#allocation3], 0 }
   0x3   :  { %10 = vsyncpa [#allocation3 + $0x1], 0 }
   0x4   :  { %11 = vsyncpa [#allocation6], 0 }
   0x5   :  { %13 = vsyncpa [#allocation6 + $0x1], 0 }
   0x6   :  { %14 = vsyncpa [#allocation4], 0 }
   0x7   :  { %16 = vsyncpa [#allocation4 + $0x1], 0  ;;  %s2075_s12 = smov 0   ;;  %s2077_s13 = smov 0  }
   0x8   :  { %s2079_s14 = smov 0   ;;  %s2081_s15 = smov 0  }
   0x9   :  { %s2083_s16 = smov 0   ;;  %s2085_s17 = smov 0  }
   0xa LB: > { %2670 = sst [smem:[#allocation12_spill]] %s2029_s14  ;;  %s2106_s18 = sadd.s32 4294967295, %s2041_s17   ;;  %s2041_s17 = sphi %s2085_s17, %s22_s17   ;;  %s2037_s16 = sphi %s2083_s16, %s2691_s16   ;;  %s2033_s15 = sphi %s2081_s15, %s2690_s15   ;;  %s2029_s14 = sphi %s2079_s14, %s2686_s14   ;;  %s2025_s13 = sphi %s2077_s13, %s2689_s13   ;;  %s2021_s12 = sphi %s2075_s12, %s2688_s12  }
   0xb   : > { %s1747_s19 = sadd.s32 4294967294, %s2041_s17   ;;  %s34_s20 = sadd.s32 1, %s2037_s16 }
   0xc   : > { %s43_s21 = sadd.s32 1, %s2029_s14  ;;  %p36_p0 = scmp.ge.s32.totalorder %s34_s20, 2 }
   0xd   : > { %p50_p1 = scmp.ne.s32.totalorder %s2029_s14, %s2025_s13  ;;  %p51_p2 = scmp.eq.s32.totalorder %s2041_s17, 0 }
   0xe   : > { %p56_p3 = scmp.ne.s32.totalorder %s2025_s13, %s2021_s12  ;;  %s2693_s20 = smov (%p36_p0, %s34_s20), 0 }
   0xf   : > { %2671 = sst [smem:[#allocation13_spill]] %s2693_s20  ;;  %p2118_p4 = por %p51_p2, %p50_p1 }
  0x10   : > { %p57_p5 = scmp.eq.s32.totalorder %s2106_s18, 0  ;;  %s40_s23 = ssub.s32 %s2037_s16, %s2693_s20 }
  0x11   : > { %p136_p6 = scmp.eq.s32.totalorder %s2106_s18, 1  ;;  %p41_p7 = scmp.eq.s32.totalorder %s40_s23, 0 }
  0x12   : > { %p2126_p8 = por %p57_p5, %p56_p3  ;;  %p142_p10 = scmp.eq.s32.totalorder %s1747_s19, 1 }
  0x13   : > { %p2130_p9 = por %p136_p6, %p50_p1  ;;  %p1793_p13 = scmp.lt.s32.totalorder %s2041_s17, 2 }
  0x14   : > { %s2135_s26 = scalar_select %p41_p7, %s2029_s14, %s43_s21  }
  0x15   : > { %p2137_p11 = por %p142_p10, %p56_p3  ;;  %s2144_s28 = sand.u32 1, %s2029_s14  }
  0x16   : > { %2675 = sst [smem:[#allocation14_spill]] %s2135_s26  ;;  %s1750_s29 = sshll.u32 %s2144_s28, 3 }
  0x17   : > { %s1751_s30 = sshll.u32 %s2037_s16, 7  ;;  %p2150_p0 = pnand %p1793_p13, %p2118_p4 }
  0x18   : > { %s181_s5 = sand.u32 1, %s2041_s17   ;;  %s2678_s1 = sld [smem:[#allocation15_spill]] }
  0x19   : > { %s185_s9 = scalar_lea.vmem [#allocation5], %s1750_s29  ;;  %s1754_s11 = sshll.u32 %s2144_s28, 6 }
  0x1a   : > { %s193_s10 = sshll.u32 %s185_s9, 4  ;;  %s2163_s19 = scalar_lea.sflag [#allocation6], %s181_s5  ;;  %s194_s10 = int_to_ptr.vmem [resolvable:$true] %s193_s10 }
  0x1b   : > { %p1875_p1 = pneg %p2150_p0  ;;  %s1886_s21 = scalar_lea.vmem %s194_s10, 128 }
  0x1c   : > { %p1887_p2 = scmp.ne.s32.totalorder %s194_s10, %s1886_s21  ;;  %s2043_s22 = smov [#allocation5]  }
  0x1d   : > { %s1891_s23 = sshll.u32 %s2043_s22, 4  ;;  %s1892_s23 = int_to_ptr.vmem [resolvable:$false] %s1891_s23 }
  0x1e   : > { %s191_s8 = scalar_lea.hbm %s2678_s1, %s1751_s30  ;;  %p1889_p3 = pnand %p1887_p2, %p1875_p1 }
  0x1f   : > { %s1893_s6 = scalar_lea.vmem %s1892_s23, 256  ;;  %p1894_p5 = scmp.lt.s32.totalorder %s194_s10, %s1892_s23 }
  0x20   : > { %p1890_p4 = pneg %p1889_p3  ;;  %p1895_p6 = scmp.lt.s32.totalorder %s1893_s6, %s1886_s21 }
  0x22   : > { %p1896_p7 = por %p1895_p6, %p1894_p5 }
  0x24   : > { %p1897_p10 = pnand %p1896_p7, %p1890_p4 }
  0x26   : > { %1900 = shalt.err (!%p1897_p10)
}
  0x27   : > { %1785 = dma.hbm_to_vmem [thread:$0]  (!%p2150_p0), %s191_s8, 128, %s194_s10, %s2163_s19  }
  0x28   : > { %s204_s5 = scalar_lea.vmem [#allocation7], %s1754_s11  ;;  %p1757_p13 = scmp.ge.s32.totalorder %s2041_s17, 1 }
  0x29   : > { %s212_s7 = sshll.u32 %s204_s5, 4  ;;  %p220_p2 = scmp.lt.s32.totalorder %s2041_s17, 3  ;;  %s2174_s7 = int_to_ptr.vmem [resolvable:$true] %s212_s7 }
  0x2a   : > { %s172_s23 = scalar_lea.hbm %s2663_s0, %s1751_s30  ;;  %s166_s6 = scalar_lea.vmem [#allocation2], %s1750_s29 }
  0x2b   : > { %p2177_p3 = pnand %p1757_p13, %p220_p2  ;;  %s174_s1 = sshll.u32 %s166_s6, 4  ;;  %s175_s1 = int_to_ptr.vmem [resolvable:$true] %s174_s1 }
  0x2c   : > { %s1770_s8 = sshll.u32 %s2037_s16, 10  ;;  %s163_s20 = scalar_lea.sflag [#allocation3], %s2144_s28 }
  0x2d   : > { %s2192_s5 = scalar_lea.hbm %s2665_s2, %s1770_s8  ;;  %s1914_s26 = scalar_lea.vmem %s175_s1, 128 }
  0x2e   : > { %p1915_p4 = scmp.ne.s32.totalorder %s175_s1, %s1914_s26  ;;  %s2044_s14 = smov [#allocation2]  }
  0x2f   : > { %s1919_s21 = sshll.u32 %s2044_s14, 4  ;;  %s1920_s21 = int_to_ptr.vmem [resolvable:$false] %s1919_s21 }
  0x30   : > { %p1917_p5 = pnand %p1915_p4, %p1875_p1  ;;  %s1921_s30 = scalar_lea.vmem %s1920_s21, 256 }
  0x31   : > { %p1922_p7 = scmp.lt.s32.totalorder %s175_s1, %s1920_s21  ;;  %p1923_p10 = scmp.lt.s32.totalorder %s1921_s30, %s1914_s26 }
  0x32   : > { %p1918_p6 = pneg %p1917_p5 }
  0x33   : > { %p1924_p13 = por %p1923_p10, %p1922_p7 }
  0x35   : > { %p1925_p2 = pnand %p1924_p13, %p1918_p6 }
  0x37   : > { %1928 = shalt.err (!%p1925_p2)
}
  0x38   : > { %1782 = dma.hbm_to_vmem [thread:$0]  (!%p2150_p0), %s172_s23, 128, %s175_s1, %s163_s20  }
  0x39   : > { %s1942_s28 = scalar_lea.vmem %s2174_s7, 1024  ;;  %s2045_s14 = smov [#allocation7]  }
  0x3a   : > { %p1943_p12 = scmp.ne.s32.totalorder %s2174_s7, %s1942_s28  ;;  %s1947_s29 = sshll.u32 %s2045_s14, 4  ;;  %s1948_s29 = int_to_ptr.vmem [resolvable:$false] %s1947_s29 }
  0x3b   : > { %s1949_s26 = scalar_lea.vmem %s1948_s29, 2048  ;;  %p1950_p7 = scmp.lt.s32.totalorder %s2174_s7, %s1948_s29 }
  0x3c   : > { %p1945_p4 = pnand %p1943_p12, %p1875_p1  ;;  %p1951_p6 = scmp.lt.s32.totalorder %s1949_s26, %s1942_s28 }
  0x3e   : > { %p1946_p5 = pneg %p1945_p4  ;;  %p1952_p10 = por %p1951_p6, %p1950_p7 }
  0x40   : > { %p1953_p13 = pnand %p1952_p10, %p1946_p5 }
  0x42   : > { %1956 = shalt.err (!%p1953_p13)
}
  0x43   : > { %s2046_s22 = smov 128   ;;  %s2047_s1 = smov 8  }
  0x44   : > { %1788 = dma.hbm_to_vmem [thread:$0]  (!%p2150_p0), %s2192_s5, 1024, %s2174_s7, %s2163_s19, %s2046_s22, %s2046_s22, %s2047_s1  }
  0x45   : > { %224 = sbr.rel (%p2177_p3) target bundleno = 820 (0x334), region = 32  ;;  %s2214_s20 = sand.u32 (!%p2177_p3), 1, %s2025_s13  }
  0x46   : > { %s1758_s23 = sshll.u32 (!%p2177_p3), %s2214_s20, 3  ;;  %s227_s6 = scalar_lea.sflag (!%p2177_p3), [#allocation3], %s2214_s20 }
  0x47   : > { %s230_s8 = scalar_lea.vmem (!%p2177_p3), [#allocation2], %s1758_s23 }
  0x4a   : > { %2008 = dma.done.wait (%p2126_p8), %s227_s6, 128  }
  0x4b   : > { %2010 = vsyncadd (%p2126_p8), %s227_s6, 4294967168  ;;  %s235_s4 = sand.u32 1, %s2106_s18   ;;  %s239_s7 = scalar_lea.vmem [#allocation5], %s1758_s23 }
  0x4c   : > { %s236_s19 = scalar_lea.sflag [#allocation6], %s235_s4 }
  0x4d   : > { %2012 = dma.done.wait (%p2126_p8), %s236_s19, 1152  }
  0x4e   : > { %2014 = vsyncadd (%p2126_p8), %s236_s19, 4294966144  ;;  %vm289_vm0 = vcmask 64512   ;;  %v305_v0 = vlaneseq  ;;  %s2227_s9 = scalar_lea.vmem [#allocation8], %s1758_s23  ;;  %v2048_v1 = vmov 0.0   ;;  %v2049_v2 = vmov 1966171168  }
  0x4f   : > { %290 = vst.msk [vmem:[%s2227_s9] sm:$0xff] %vm289_vm0, %v2048_v1  ;;  %v303_v3 = vunpack.c.l.s4 %v2049_v2  ;;  %s1760_s18 = sshll.u32 %s2214_s20, 6  ;;  %v2239_v9 = vld [vmem:[%s239_s7] sm:$0xff]  ;;  %v291_v10 = vld [vmem:[%s230_s8] sm:$0xff]  ;;  %vm398_vm1 = vcmask 261120   ;;  %s2050_s10 = smov 32  }
  0x50   : > { %v306_v4 = vshrl.u32 %v305_v0, 7  ;;  %v2231_v5 = vand.u32 127, %v305_v0  ;;  %v301_v14 = vcombine.high %v291_v10, %v291_v10  ;;  %s2250_s24 = scalar_lea.vmem [#allocation7], %s1760_s18  ;;  %v529_v59 = vcombine.high %v2239_v9, %v2239_v9  ;;  %s2051_s11 = smov 64  }
  0x51   : > { %v304_v6 = vunpack.c.0.s8 %v303_v3  ;;  %v2253_v19 = vld [vmem:[%s2250_s24] sm:$0xff]  ;;  %v2263_v25 = vld [vmem:[%s2250_s24 + $0x10] sm:$0xff]  ;;  %v2266_v26 = vld [vmem:[%s2250_s24 + $0x8] sm:$0xff]  ;;  %s2052_s5 = smov 96   ;;  %vm465_vm2 = vcmask 1041409   ;;  %vm467_vm3 = vcmask 1042434  }
  0x52   : > { %v2234_v7 = vsub.s32 %v2231_v5, %v306_v4  ;;  %v2241_v11 = vsub.s32 0, %v306_v4  ;;  %v2279_v36 = vld [vmem:[%s2250_s24 + $0x20] sm:$0xff]  ;;  %v2294_v49 = vld [vmem:[%s2250_s24 + $0x18] sm:$0xff]  ;;  %v2297_v50 = vld [vmem:[%s2250_s24 + $0x30] sm:$0xff]  ;;  %vm469_vm4 = vcmask 1043459   ;;  %vm471_vm5 = vcmask 1044484  }
  0x53   : > { %v2237_v8 = vsub.s32 %v304_v6, %v306_v4  ;;  %v2306_v58 = vld [vmem:[%s2250_s24 + $0x28] sm:$0xff]  ;;  %v2317_v1 = vld [vmem:[%s2250_s24 + $0x38] sm:$0xff]  ;;  %vm473_vm6 = vcmask 1045509   ;;  %vm475_vm7 = vcmask 1046534   ;;  %vm477_vm8 = vcmask 1047559   ;;  %s1762_s21 = sshll.u32 %s2033_s15, 3 }
  0x54   : > { %s2565_s30 = sadd.s32 8, %s1762_s21 }
  0x55   : > { %v536_v12 = vrot.slane %v2239_v9, %v2237_v8  ;;  %v308_v13 = vrot.slane %v291_v10, %v2237_v8  ;;  %v315_v20 = vrot.slane %v301_v14, %v2237_v8  ;;  %v543_v2 = vrot.slane %v529_v59, %v2237_v8  ;;  %p1763_p8 = scmp.gt.s32.totalorder %s2565_s30, 10 }
  0x57   : > { %v2247_v15 = vrot.slane %v536_v12, %v2237_v8  ;;  %v324_v16 = vrot.slane %v308_v13, %v2237_v8  ;;  %v316_v17 = vcombine.high %v308_v13, %v308_v13  ;;  %v544_v18 = vcombine.high %v536_v12, %v536_v12 }
  0x58   : > { %v331_v28 = vrot.slane %v315_v20, %v2237_v8  ;;  %v317_v29 = vcombine.high %v315_v20, %v315_v20  ;;  %v559_v10 = vrot.slane %v543_v2, %v2237_v8 }
  0x59   : > { %v2258_v21 = vrot.slane %v2247_v15, %v2241_v11  ;;  %v353_v22 = vrot.slane %v324_v16, %v2241_v11  ;;  %v346_v23 = vcombine.high %v324_v16, %v324_v16  ;;  %v338_v24 = vrot.slane %v316_v17, %v2237_v8 }
  0x5a   : > { %v566_v27 = vrot.slane %v544_v18, %v2237_v8  ;;  %v369_v37 = vrot.slane %v331_v28, %v2241_v11  ;;  %v345_v44 = vrot.slane %v317_v29, %v2237_v8  ;;  %v347_v48 = vcombine.high %v331_v28, %v331_v28 }
  0x5b   : > { %v618_v30 = vmul.f32 %v2258_v21, %v2253_v19  ;;  %v390_v31 = vmul.f32 %v353_v22, %v2253_v19  ;;  %v361_v32 = vrot.slane %v346_v23, %v2241_v11  ;;  %v357_v33 = vrot.slane %v338_v24, %v2241_v11 }
  0x5c   : > { %v2276_v34 = vrot.slane %v566_v27, %v2241_v11  ;;  %v348_v35 = vcombine.high %v338_v24, %v338_v24  ;;  %v394_v47 = vmul.f32 %v369_v37, %v2279_v36  ;;  %v377_v51 = vrot.slane %v347_v48, %v2241_v11 }
  0x5d   : > { %v626_v38 = vsel %vm398_vm1, %v618_v30, 0.0  ;;  %v399_v39 = vsel %vm398_vm1, %v390_v31, 0.0  ;;  %v392_v40 = vmul.f32 %v361_v32, %v2263_v25  ;;  %v391_v41 = vmul.f32 %v357_v33, %v2266_v26 }
  0x5e   : > { %627 = vadd.xlane.f32.xlu1 %v626_v38  ;;  %400 = vadd.xlane.f32.xlu0 %v399_v39  ;;  %v619_v42 = vmul.f32 %v2276_v34, %v2266_v26  ;;  %v365_v43 = vrot.slane %v348_v35, %v2241_v11  ;;  %v373_v53 = vrot.slane %v345_v44, %v2241_v11  ;;  %v411_v55 = vsel %vm398_vm1, %v394_v47, 0.0 }
  0x5f   : > { %v405_v45 = vsel %vm398_vm1, %v392_v40, 0.0  ;;  %v402_v46 = vsel %vm398_vm1, %v391_v41, 0.0  ;;  %v396_v56 = vmul.f32 %v377_v51, %v2297_v50  ;;  %v349_v57 = vcombine.high %v345_v44, %v345_v44 }
  0x60   : > { %v629_v52 = vsel %vm398_vm1, %v619_v42, 0.0  ;;  %v393_v54 = vmul.f32 %v365_v43, %v2294_v49  ;;  %v574_v60 = vcombine.high %v2247_v15, %v2247_v15  ;;  %v395_v62 = vmul.f32 %v373_v53, %v2306_v58 }
  0x61   : > { %v417_v63 = vsel %vm398_vm1, %v396_v56, 0.0  ;;  %v381_v0 = vrot.slane %v349_v57, %v2241_v11  ;;  %v576_v9 = vcombine.high %v566_v27, %v566_v27  ;;  %v545_v15 = vcombine.high %v543_v2, %v543_v2 }
  0x62   : > { %406 = vadd.xlane.f32.xlu1 %v405_v45  ;;  %403 = vadd.xlane.f32.xlu0 %v402_v46  ;;  %v408_v61 = vsel %vm398_vm1, %v393_v54, 0.0  ;;  %v414_v3 = vsel %vm398_vm1, %v395_v62, 0.0  ;;  %v2323_v6 = vrot.slane %v574_v60, %v2241_v11  ;;  %v2336_v18 = vrot.slane %v559_v10, %v2241_v11 }
  0x63   : > { %v397_v4 = vmul.f32 %v381_v0, %v2317_v1  ;;  %v2330_v14 = vrot.slane %v576_v9, %v2241_v11  ;;  %v573_v20 = vrot.slane %v545_v15, %v2237_v8  ;;  %v575_v27 = vcombine.high %v559_v10, %v559_v10 }
  0x64   : > { %v620_v13 = vmul.f32 %v2323_v6, %v2263_v25  ;;  %v622_v23 = vmul.f32 %v2336_v18, %v2279_v36 }
  0x65   : > { %v420_v12 = vsel %vm398_vm1, %v397_v4, 0.0  ;;  %v621_v17 = vmul.f32 %v2330_v14, %v2294_v49  ;;  %v2343_v24 = vrot.slane %v573_v20, %v2241_v11  ;;  %v2349_v30 = vrot.slane %v575_v27, %v2241_v11 }
  0x66   : > { %630 = vadd.xlane.f32.xlu1 %v629_v52  ;;  %412 = vadd.xlane.f32.xlu0 %v411_v55  ;;  %v632_v16 = vsel %vm398_vm1, %v620_v13, 0.0  ;;  %v638_v28 = vsel %vm398_vm1, %v622_v23, 0.0  ;;  %v577_v8 = vcombine.high %v573_v20, %v573_v20 }
  0x67   : > { %v635_v22 = vsel %vm398_vm1, %v621_v17, 0.0  ;;  %v623_v29 = vmul.f32 %v2343_v24, %v2306_v58  ;;  %v624_v32 = vmul.f32 %v2349_v30, %v2297_v50 }
  0x68   : > { %v2355_v33 = vrot.slane %v577_v8, %v2241_v11 }
  0x69   : > { %v641_v31 = vsel %vm398_vm1, %v623_v29, 0.0  ;;  %v644_v35 = vsel %vm398_vm1, %v624_v32, 0.0 }
  0x6a   : > { %409 = vadd.xlane.f32.xlu1 %v408_v61  ;;  %418 = vadd.xlane.f32.xlu0 %v417_v63  ;;  %v625_v37 = vmul.f32 %v2355_v33, %v2317_v1 }
  0x6c   : > { %v647_v38 = vsel %vm398_vm1, %v625_v37, 0.0 }
  0x6e   : > { %415 = vadd.xlane.f32.xlu1 %v414_v3 }
  0x72   : > { %421 = vadd.xlane.f32.xlu1 %v420_v12 }
  0x76   : > { %633 = vadd.xlane.f32.xlu1 %v632_v16 }
  0x7a   : > { %636 = vadd.xlane.f32.xlu1 %v635_v22 }
  0x7e   : > { %639 = vadd.xlane.f32.xlu1 %v638_v28 }
  0x80   : > { %846 = vrot.lane.b32.xlu0 %v2253_v19, %s2050_s10 }
  0x82   : > { %642 = vadd.xlane.f32.xlu1 %v641_v31 }
  0x84   : > { %850 = vrot.lane.b32.xlu0 %v2263_v25, %s2050_s10 }
  0x86   : > { %645 = vadd.xlane.f32.xlu1 %v644_v35 }
  0x88   : > { %852 = vrot.lane.b32.xlu0 %v2294_v49, %s2050_s10 }
  0x8a   : > { %648 = vadd.xlane.f32.xlu1 %v647_v38 }
  0x8c   : > { %854 = vrot.lane.b32.xlu0 %v2279_v36, %s2050_s10 }
  0x90   : > { %856 = vrot.lane.b32.xlu0 %v2306_v58, %s2050_s10 }
  0x94   : > { %858 = vrot.lane.b32.xlu0 %v2297_v50, %s2050_s10 }
  0x98   : > { %860 = vrot.lane.b32.xlu0 %v2317_v1, %s2050_s10 }
  0x9b   : > { %848 = vrot.lane.b32.xlu1 %v2266_v26, %s2050_s10 }
  0x9c   : > { %1124 = vrot.lane.b32.xlu0 %v2266_v26, %s2051_s11 }
  0x9f   : > { %1122 = vrot.lane.b32.xlu1 %v2253_v19, %s2051_s11 }
  0xa0   : > { %1128 = vrot.lane.b32.xlu0 %v2294_v49, %s2051_s11 }
  0xa3   : > { %1126 = vrot.lane.b32.xlu1 %v2263_v25, %s2051_s11 }
  0xa4   : > { %1400 = vrot.lane.b32.xlu0 %v2266_v26, %s2052_s5 }
  0xa7   : > { %1398 = vrot.lane.b32.xlu1 %v2253_v19, %s2052_s5 }
  0xa8   : > { %1402 = vrot.lane.b32.xlu0 %v2263_v25, %s2052_s5 }
  0xab   : > { %1130 = vrot.lane.b32.xlu1 %v2279_v36, %s2051_s11 }
  0xac   : > { %1404 = vrot.lane.b32.xlu0 %v2294_v49, %s2052_s5 }
  0xaf   : > { %1132 = vrot.lane.b32.xlu1 %v2306_v58, %s2051_s11 }
  0xb0   : > { %1406 = vrot.lane.b32.xlu0 %v2279_v36, %s2052_s5 }
  0xb3   : > { %1134 = vrot.lane.b32.xlu1 %v2297_v50, %s2051_s11 }
  0xb4   : > { %1408 = vrot.lane.b32.xlu0 %v2306_v58, %s2052_s5 }
  0xb7   : > { %1136 = vrot.lane.b32.xlu1 %v2317_v1, %s2051_s11 }
  0xb8   : > { %1412 = vrot.lane.b32.xlu0 %v2317_v1, %s2052_s5 }
  0xbb   : > { %1410 = vrot.lane.b32.xlu1 %v2297_v50, %s2052_s5 }
  0xe7   : > { %v628_v11 = vpop.xlane.xlu1 %627  ;;  %v401_v19 = vpop.xlane.xlu0 %400 }
  0xe8   : > { %v436_v25 = vrot.slane %v401_v19, %v2234_v7  ;;  %v661_v3 = vrot.slane %v628_v11, %v2234_v7 }
  0xeb   : > { %v407_v26 = vpop.xlane.xlu1 %406  ;;  %v404_v36 = vpop.xlane.xlu0 %403 }
  0xec   : > { %v440_v39 = vrot.slane %v404_v36, %v2234_v7  ;;  %v444_v43 = vrot.slane %v407_v26, %v2234_v7 }
  0xee   : > { %v466_v40 = vsel %vm465_vm2, %v440_v39, %v436_v25 }
  0xef   : > { %v631_v41 = vpop.xlane.xlu1 %630  ;;  %v413_v42 = vpop.xlane.xlu0 %412  ;;  %v468_v48 = vsel %vm467_vm3, %v444_v43, %v466_v40 }
  0xf0   : > { %v452_v45 = vrot.slane %v413_v42, %v2234_v7  ;;  %v665_v1 = vrot.slane %v631_v41, %v2234_v7 }
  0xf2   : > { %v690_v10 = vsel %vm465_vm2, %v665_v1, %v661_v3 }
  0xf3   : > { %v410_v44 = vpop.xlane.xlu1 %409  ;;  %v419_v46 = vpop.xlane.xlu0 %418 }
  0xf4   : > { %v448_v47 = vrot.slane %v410_v44, %v2234_v7  ;;  %v460_v52 = vrot.slane %v419_v46, %v2234_v7 }
  0xf6   : > { %v470_v49 = vsel %vm469_vm4, %v448_v47, %v468_v48 }
  0xf7   : > { %v472_v50 = vsel %vm471_vm5, %v452_v45, %v470_v49  ;;  %v416_v51 = vpop.xlane.xlu1 %415  ;;  %v847_v53 = vpop.permute.xlu0 %846 }
  0xf8   : > { %v456_v54 = vrot.slane %v416_v51, %v2234_v7  ;;  %v870_v55 = vmul.f32 %v847_v53, %v2258_v21 }
  0xfa   : > { %886 = vrot.lane.b32.xlu0 %v870_v55, %s2052_s5  ;;  %v474_v56 = vsel %vm473_vm6, %v456_v54, %v472_v50 }
  0xfb   : > { %v422_v57 = vpop.xlane.xlu1 %421  ;;  %v851_v58 = vpop.permute.xlu0 %850  ;;  %v476_v59 = vsel %vm475_vm7, %v460_v52, %v474_v56 }
  0xfc   : > { %v464_v60 = vrot.slane %v422_v57, %v2234_v7  ;;  %v872_v61 = vmul.f32 %v851_v58, %v2323_v6 }
  0xfe   : > { %890 = vrot.lane.b32.xlu0 %v872_v61, %s2052_s5  ;;  %v2428_v62 = vsel %vm477_vm8, %v464_v60, %v476_v59 }
  0xff   : > { %v634_v63 = vpop.xlane.xlu1 %633  ;;  %v853_v0 = vpop.permute.xlu0 %852 }
 0x100   : > { %v669_v2 = vrot.slane %v634_v63, %v2234_v7  ;;  %v873_v43 = vmul.f32 %v853_v0, %v2330_v14 }
 0x102   : > { %v691_v15 = vsel %vm467_vm3, %v669_v2, %v690_v10 }
 0x103   : > { %v637_v4 = vpop.xlane.xlu1 %636  ;;  %v855_v9 = vpop.permute.xlu0 %854 }
 0x104   : > { %v673_v12 = vrot.slane %v637_v4, %v2234_v7  ;;  %v874_v13 = vmul.f32 %v855_v9, %v2336_v18 }
 0x106   : > { %v692_v16 = vsel %vm469_vm4, %v673_v12, %v691_v15  ;;  %894 = vrot.lane.b32.xlu0 %v874_v13, %s2052_s5 }
 0x107   : > { %v640_v17 = vpop.xlane.xlu1 %639  ;;  %v857_v20 = vpop.permute.xlu0 %856 }
 0x108   : > { %v677_v22 = vrot.slane %v640_v17, %v2234_v7  ;;  %v875_v46 = vmul.f32 %v857_v20, %v2343_v24 }
 0x10a   : > { %v693_v23 = vsel %vm471_vm5, %v677_v22, %v692_v16 }
 0x10b   : > { %v643_v27 = vpop.xlane.xlu1 %642  ;;  %v859_v28 = vpop.permute.xlu0 %858 }
 0x10c   : > { %v681_v29 = vrot.slane %v643_v27, %v2234_v7  ;;  %v876_v8 = vmul.f32 %v859_v28, %v2349_v30 }
 0x10e   : > { %v694_v31 = vsel %vm473_vm6, %v681_v29, %v693_v23  ;;  %898 = vrot.lane.b32.xlu0 %v876_v8, %s2052_s5 }
 0x10f   : > { %v646_v32 = vpop.xlane.xlu1 %645  ;;  %v861_v35 = vpop.permute.xlu0 %860 }
 0x110   : > { %v685_v37 = vrot.slane %v646_v32, %v2234_v7  ;;  %v877_v48 = vmul.f32 %v861_v35, %v2355_v33 }
 0x112   : > { %v695_v38 = vsel %vm475_vm7, %v685_v37, %v694_v31 }
 0x113   : > { %v649_v11 = vpop.xlane.xlu1 %648  ;;  %v1125_v19 = vpop.permute.xlu0 %1124 }
 0x114   : > { %v689_v25 = vrot.slane %v649_v11, %v2234_v7  ;;  %v1147_v52 = vmul.f32 %v1125_v19, %v2276_v34 }
 0x116   : > { %v2449_v26 = vsel %vm477_vm8, %v689_v25, %v695_v38 }
 0x117   : > { %v849_v36 = vpop.permute.xlu1 %848  ;;  %v1129_v39 = vpop.permute.xlu0 %1128 }
 0x118   : > { %v871_v40 = vmul.f32 %v849_v36, %v2276_v34  ;;  %v1149_v56 = vmul.f32 %v1129_v39, %v2330_v14 }
 0x11a   : > { %888 = vrot.lane.b32.xlu1 %v871_v40, %s2052_s5 }
 0x11b   : > { %v1123_v41 = vpop.permute.xlu1 %1122  ;;  %v1401_v42 = vpop.permute.xlu0 %1400 }
 0x11c   : > { %v1146_v50 = vmul.f32 %v1123_v41, %v2258_v21  ;;  %v1423_v61 = vmul.f32 %v1401_v42, %v2276_v34 }
 0x11e   : > { %892 = vrot.lane.b32.xlu1 %v873_v43, %s2052_s5 }
 0x11f   : > { %v1127_v44 = vpop.permute.xlu1 %1126  ;;  %v1403_v45 = vpop.permute.xlu0 %1402 }
 0x120   : > { %v1424_v47 = vmul.f32 %v1403_v45, %v2323_v6  ;;  %v1148_v54 = vmul.f32 %v1127_v44, %v2323_v6 }
 0x122   : > { %896 = vrot.lane.b32.xlu1 %v875_v46, %s2052_s5  ;;  %1442 = vrot.lane.b32.xlu0 %v1424_v47, %s2050_s10 }
 0x123   : > { %v1399_v49 = vpop.permute.xlu1 %1398  ;;  %v1405_v0 = vpop.permute.xlu0 %1404 }
 0x124   : > { %v1422_v58 = vmul.f32 %v1399_v49, %v2258_v21  ;;  %v1425_v21 = vmul.f32 %v1405_v0, %v2330_v14 }
 0x126   : > { %900 = vrot.lane.b32.xlu1 %v877_v48, %s2052_s5 }
 0x127   : > { %v1131_v51 = vpop.permute.xlu1 %1130  ;;  %v1407_v34 = vpop.permute.xlu0 %1406 }
 0x128   : > { %v1150_v6 = vmul.f32 %v1131_v51, %v2336_v18  ;;  %v1426_v2 = vmul.f32 %v1407_v34, %v2336_v18 }
 0x12a   : > { %1162 = vrot.lane.b32.xlu1 %v1146_v50, %s2051_s11 }
 0x12b   : > { %v1133_v53 = vpop.permute.xlu1 %1132  ;;  %v1409_v3 = vpop.permute.xlu0 %1408 }
 0x12c   : > { %v1151_v63 = vmul.f32 %v1133_v53, %v2343_v24  ;;  %v1427_v9 = vmul.f32 %v1409_v3, %v2343_v24 }
 0x12e   : > { %1164 = vrot.lane.b32.xlu1 %v1147_v52, %s2051_s11 }
 0x12f   : > { %v1135_v55 = vpop.permute.xlu1 %1134  ;;  %v1413_v10 = vpop.permute.xlu0 %1412 }
 0x130   : > { %v1152_v1 = vmul.f32 %v1135_v55, %v2349_v30  ;;  %v1429_v14 = vmul.f32 %v1413_v10, %v2355_v33 }
 0x132   : > { %1166 = vrot.lane.b32.xlu1 %v1148_v54, %s2051_s11 }
 0x133   : > { %v1137_v57 = vpop.permute.xlu1 %1136 }
 0x134   : > { %v1153_v4 = vmul.f32 %v1137_v57, %v2355_v33 }
 0x136   : > { %1168 = vrot.lane.b32.xlu1 %v1149_v56, %s2051_s11 }
 0x137   : > { %v1411_v59 = vpop.permute.xlu1 %1410 }
 0x138   : > { %v1428_v60 = vmul.f32 %v1411_v59, %v2349_v30 }
 0x13a   : > { %1438 = vrot.lane.b32.xlu1 %v1422_v58, %s2050_s10  ;;  %1450 = vrot.lane.b32.xlu0 %v1428_v60, %s2050_s10 }
 0x13e   : > { %1440 = vrot.lane.b32.xlu1 %v1423_v61, %s2050_s10 }
 0x142   : > { %1170 = vrot.lane.b32.xlu1 %v1150_v6, %s2051_s11 }
 0x146   : > { %1172 = vrot.lane.b32.xlu1 %v1151_v63, %s2051_s11 }
 0x14a   : > { %1444 = vrot.lane.b32.xlu1 %v1425_v21, %s2050_s10 }
 0x14e   : > { %1174 = vrot.lane.b32.xlu1 %v1152_v1, %s2051_s11 }
 0x152   : > { %1446 = vrot.lane.b32.xlu1 %v1426_v2, %s2050_s10 }
 0x156   : > { %1176 = vrot.lane.b32.xlu1 %v1153_v4, %s2051_s11 }
 0x15a   : > { %1448 = vrot.lane.b32.xlu1 %v1427_v9, %s2050_s10 }
 0x15e   : > { %1452 = vrot.lane.b32.xlu1 %v1429_v14, %s2050_s10 }
 0x16c   : > { %v887_v30 = vpop.permute.xlu0 %886 }
 0x16d   : > { %v910_v12 = vsel %vm398_vm1, %v887_v30, 0.0 }
 0x16e   : > { %911 = vadd.xlane.f32.xlu0 %v910_v12 }
 0x170   : > { %v891_v18 = vpop.permute.xlu0 %890 }
 0x171   : > { %v916_v13 = vsel %vm398_vm1, %v891_v18, 0.0 }
 0x178   : > { %v895_v27 = vpop.permute.xlu0 %894 }
 0x179   : > { %v922_v29 = vsel %vm398_vm1, %v895_v27, 0.0 }
 0x180   : > { %v899_v11 = vpop.permute.xlu0 %898 }
 0x181   : > { %v928_v40 = vsel %vm398_vm1, %v899_v11, 0.0 }
 0x182   : > { %917 = vadd.xlane.f32.xlu1 %v916_v13 }
 0x18c   : > { %v889_v15 = vpop.permute.xlu1 %888 }
 0x18d   : > { %v913_v16 = vsel %vm398_vm1, %v889_v15, 0.0 }
 0x18e   : > { %914 = vadd.xlane.f32.xlu0 %v913_v16 }
 0x190   : > { %v893_v24 = vpop.permute.xlu1 %892 }
 0x191   : > { %v919_v17 = vsel %vm398_vm1, %v893_v24, 0.0 }
 0x192   : > { %920 = vadd.xlane.f32.xlu0 %v919_v17 }
 0x194   : > { %v897_v20 = vpop.permute.xlu1 %896  ;;  %v1443_v39 = vpop.permute.xlu0 %1442 }
 0x195   : > { %v925_v32 = vsel %vm398_vm1, %v897_v20, 0.0  ;;  %v1468_v42 = vsel %vm398_vm1, %v1443_v39, 0.0 }
 0x198   : > { %v901_v33 = vpop.permute.xlu1 %900 }
 0x199   : > { %v931_v46 = vsel %vm398_vm1, %v901_v33, 0.0 }
 0x19c   : > { %v1163_v22 = vpop.permute.xlu1 %1162 }
 0x19d   : > { %v1186_v23 = vsel %vm398_vm1, %v1163_v22, 0.0 }
 0x19e   : > { %1187 = vadd.xlane.f32.xlu0 %v1186_v23 }
 0x1a0   : > { %v1165_v28 = vpop.permute.xlu1 %1164 }
 0x1a1   : > { %v1189_v8 = vsel %vm398_vm1, %v1165_v28, 0.0 }
 0x1a2   : > { %923 = vadd.xlane.f32.xlu0 %v922_v29  ;;  %1190 = vadd.xlane.f32.xlu1 %v1189_v8 }
 0x1a4   : > { %v1167_v31 = vpop.permute.xlu1 %1166 }
 0x1a5   : > { %v1192_v35 = vsel %vm398_vm1, %v1167_v31, 0.0 }
 0x1a6   : > { %926 = vadd.xlane.f32.xlu0 %v925_v32  ;;  %1193 = vadd.xlane.f32.xlu1 %v1192_v35 }
 0x1a8   : > { %v1169_v37 = vpop.permute.xlu1 %1168 }
 0x1a9   : > { %v1195_v38 = vsel %vm398_vm1, %v1169_v37, 0.0 }
 0x1aa   : > { %1196 = vadd.xlane.f32.xlu1 %v1195_v38 }
 0x1ac   : > { %v1439_v19 = vpop.permute.xlu1 %1438  ;;  %v1451_v55 = vpop.permute.xlu0 %1450 }
 0x1ad   : > { %v1462_v25 = vsel %vm398_vm1, %v1439_v19, 0.0  ;;  %v1480_v57 = vsel %vm398_vm1, %v1451_v55, 0.0 }
 0x1ae   : > { %1463 = vadd.xlane.f32.xlu0 %v1462_v25 }
 0x1b0   : > { %v1441_v36 = vpop.permute.xlu1 %1440 }
 0x1b1   : > { %v1465_v41 = vsel %vm398_vm1, %v1441_v36, 0.0 }
 0x1b2   : > { %929 = vadd.xlane.f32.xlu0 %v928_v40  ;;  %1466 = vadd.xlane.f32.xlu1 %v1465_v41 }
 0x1b4   : > { %v1171_v43 = vpop.permute.xlu1 %1170 }
 0x1b5   : > { %v1198_v44 = vsel %vm398_vm1, %v1171_v43, 0.0 }
 0x1b6   : > { %1469 = vadd.xlane.f32.xlu0 %v1468_v42  ;;  %1199 = vadd.xlane.f32.xlu1 %v1198_v44 }
 0x1b8   : > { %v1173_v45 = vpop.permute.xlu1 %1172 }
 0x1b9   : > { %v1201_v47 = vsel %vm398_vm1, %v1173_v45, 0.0 }
 0x1ba   : > { %932 = vadd.xlane.f32.xlu1 %v931_v46  ;;  %1202 = vadd.xlane.f32.xlu0 %v1201_v47 }
 0x1bc   : > { %v1445_v48 = vpop.permute.xlu1 %1444 }
 0x1bd   : > { %v1471_v49 = vsel %vm398_vm1, %v1445_v48, 0.0 }
 0x1be   : > { %1472 = vadd.xlane.f32.xlu1 %v1471_v49 }
 0x1c0   : > { %v1175_v50 = vpop.permute.xlu1 %1174 }
 0x1c1   : > { %v1204_v51 = vsel %vm398_vm1, %v1175_v50, 0.0 }
 0x1c2   : > { %1205 = vadd.xlane.f32.xlu0 %v1204_v51 }
 0x1c4   : > { %v1447_v52 = vpop.permute.xlu1 %1446 }
 0x1c5   : > { %v1474_v53 = vsel %vm398_vm1, %v1447_v52, 0.0 }
 0x1c6   : > { %1475 = vadd.xlane.f32.xlu1 %v1474_v53 }
 0x1c8   : > { %v1177_v54 = vpop.permute.xlu1 %1176 }
 0x1c9   : > { %v1207_v56 = vsel %vm398_vm1, %v1177_v54, 0.0 }
 0x1ca   : > { %1208 = vadd.xlane.f32.xlu0 %v1207_v56 }
 0x1cc   : > { %v1449_v58 = vpop.permute.xlu1 %1448 }
 0x1cd   : > { %v1477_v59 = vsel %vm398_vm1, %v1449_v58, 0.0 }
 0x1ce   : > { %1481 = vadd.xlane.f32.xlu0 %v1480_v57  ;;  %1478 = vadd.xlane.f32.xlu1 %v1477_v59 }
 0x1d0   : > { %v1453_v60 = vpop.permute.xlu1 %1452 }
 0x1d1   : > { %v1483_v61 = vsel %vm398_vm1, %v1453_v60, 0.0 }
 0x1d2   : > { %1484 = vadd.xlane.f32.xlu1 %v1483_v61 }
 0x1f7   : > { %v912_v6 = vpop.xlane.xlu0 %911 }
 0x1f8   : > { %v945_v12 = vrot.slane %v912_v6, %v2234_v7 }
 0x1fb   : > { %480 = vxpose.xlu0.b32.start.end [1/1] (short) (narrow) %v2428_v62, 8 }
 0x205   : > { %698 = vxpose.xlu1.b32.start.end [1/1] (short) (narrow) %v2449_v26, 8 }
 0x20b   : > { %v918_v21 = vpop.xlane.xlu1 %917 }
 0x20c   : > { %v953_v13 = vrot.slane %v918_v21, %v2234_v7 }
 0x217   : > { %v915_v63 = vpop.xlane.xlu0 %914 }
 0x218   : > { %v949_v14 = vrot.slane %v915_v63, %v2234_v7 }
 0x21a   : > { %v974_v62 = vsel %vm465_vm2, %v949_v14, %v945_v12 }
 0x21b   : > { %v921_v0 = vpop.xlane.xlu0 %920  ;;  %v975_v17 = vsel %vm467_vm3, %v953_v13, %v974_v62 }
 0x21c   : > { %v957_v26 = vrot.slane %v921_v0, %v2234_v7 }
 0x21e   : > { %v976_v33 = vsel %vm469_vm4, %v957_v26, %v975_v17 }
 0x227   : > { %v1188_v1 = vpop.xlane.xlu0 %1187 }
 0x228   : > { %v1221_v38 = vrot.slane %v1188_v1, %v2234_v7 }
 0x22b   : > { %v1191_v34 = vpop.xlane.xlu1 %1190  ;;  %v924_v2 = vpop.xlane.xlu0 %923 }
 0x22c   : > { %v961_v15 = vrot.slane %v924_v2, %v2234_v7  ;;  %v1225_v35 = vrot.slane %v1191_v34, %v2234_v7 }
 0x22e   : > { %v977_v22 = vsel %vm471_vm5, %v961_v15, %v976_v33  ;;  %v1250_v39 = vsel %vm465_vm2, %v1225_v35, %v1221_v38 }
 0x22f   : > { %v1194_v3 = vpop.xlane.xlu1 %1193  ;;  %v927_v4 = vpop.xlane.xlu0 %926 }
 0x230   : > { %v965_v24 = vrot.slane %v927_v4, %v2234_v7  ;;  %v1229_v37 = vrot.slane %v1194_v3, %v2234_v7 }
 0x232   : > { %v978_v29 = vsel %vm473_vm6, %v965_v24, %v977_v22  ;;  %v1251_v41 = vsel %vm467_vm3, %v1229_v37, %v1250_v39 }
 0x233   : > { %v1197_v9 = vpop.xlane.xlu1 %1196 }
 0x234   : > { %v1233_v11 = vrot.slane %v1197_v9, %v2234_v7 }
 0x236   : > { %v1252_v43 = vsel %vm469_vm4, %v1233_v11, %v1251_v41 }
 0x237   : > { %v1464_v10 = vpop.xlane.xlu0 %1463 }
 0x238   : > { %v1497_v49 = vrot.slane %v1464_v10, %v2234_v7 }
 0x23b   : > { %v1467_v30 = vpop.xlane.xlu1 %1466  ;;  %v930_v18 = vpop.xlane.xlu0 %929 }
 0x23c   : > { %v969_v20 = vrot.slane %v930_v18, %v2234_v7  ;;  %v1501_v44 = vrot.slane %v1467_v30, %v2234_v7 }
 0x23e   : > { %v979_v8 = vsel %vm475_vm7, %v969_v20, %v978_v29  ;;  %v1526_v55 = vsel %vm465_vm2, %v1501_v44, %v1497_v49 }
 0x23f   : > { %v1200_v16 = vpop.xlane.xlu1 %1199  ;;  %v1470_v27 = vpop.xlane.xlu0 %1469 }
 0x240   : > { %v1237_v36 = vrot.slane %v1200_v16, %v2234_v7  ;;  %v1505_v46 = vrot.slane %v1470_v27, %v2234_v7 }
 0x242   : > { %v1253_v47 = vsel %vm471_vm5, %v1237_v36, %v1252_v43  ;;  %v1527_v57 = vsel %vm467_vm3, %v1505_v46, %v1526_v55 }
 0x243   : > { %v933_v23 = vpop.xlane.xlu1 %932  ;;  %v1203_v32 = vpop.xlane.xlu0 %1202 }
 0x244   : > { %v973_v28 = vrot.slane %v933_v23, %v2234_v7  ;;  %v1241_v40 = vrot.slane %v1203_v32, %v2234_v7 }
 0x246   : > { %v980_v31 = vsel %vm477_vm8, %v973_v28, %v979_v8  ;;  %v1254_v50 = vsel %vm473_vm6, %v1241_v40, %v1253_v47 }
 0x247   : > { %982 = vxpose.xlu0.b32.start.end [1/1] (short) (narrow) %v980_v31, 8  ;;  %v1473_v19 = vpop.xlane.xlu1 %1472 }
 0x248   : > { %v1509_v51 = vrot.slane %v1473_v19, %v2234_v7 }
 0x24a   : > { %v1528_v60 = vsel %vm469_vm4, %v1509_v51, %v1527_v57 }
 0x24b   : > { %v1206_v25 = vpop.xlane.xlu0 %1205 }
 0x24c   : > { %v1245_v42 = vrot.slane %v1206_v25, %v2234_v7 }
 0x24e   : > { %v1255_v54 = vsel %vm475_vm7, %v1245_v42, %v1254_v50 }
 0x24f   : > { %v1476_v45 = vpop.xlane.xlu1 %1475 }
 0x250   : > { %v1513_v53 = vrot.slane %v1476_v45, %v2234_v7 }
 0x252   : > { %v1529_v6 = vsel %vm471_vm5, %v1513_v53, %v1528_v60 }
 0x253   : > { %v1209_v48 = vpop.xlane.xlu0 %1208 }
 0x254   : > { %v1249_v52 = vrot.slane %v1209_v48, %v2234_v7 }
 0x256   : > { %v1256_v56 = vsel %vm477_vm8, %v1249_v52, %v1255_v54 }
 0x257   : > { %1258 = vxpose.xlu1.b32.start.end [1/1] (short) (narrow) %v1256_v56, 8  ;;  %v1479_v58 = vpop.xlane.xlu1 %1478  ;;  %v1482_v59 = vpop.xlane.xlu0 %1481 }
 0x258   : > { %v1517_v61 = vrot.slane %v1479_v58, %v2234_v7  ;;  %v1521_v63 = vrot.slane %v1482_v59, %v2234_v7 }
 0x25a   : > { %v1530_v0 = vsel %vm473_vm6, %v1517_v61, %v1529_v6 }
 0x25b   : > { %v1485_v21 = vpop.xlane.xlu1 %1484  ;;  %v1531_v34 = vsel %vm475_vm7, %v1521_v63, %v1530_v0 }
 0x25c   : > { %v1525_v1 = vrot.slane %v1485_v21, %v2234_v7 }
 0x25e   : > { %v1532_v2 = vsel %vm477_vm8, %v1525_v1, %v1531_v34 }
 0x25f   : > { %1534 = vxpose.xlu0.b32.start.end [1/1] (short) (narrow) %v1532_v2, 8 }
 0x277   : > { %v2569_v4 = vpop.trf.xlu0 }
 0x278   : > { %v513_v7 = vand.u32 2147483647, %v2569_v4  ;;  %v512_v63 = vmin.f32 %v2569_v4, 0.0 }
 0x27a   : > { %v514_v62 = vsub.f32 0.0, %v513_v7 }
 0x27c   : > { %v515_v13 = vmul.f32 1.442695, %v514_v62 }
 0x27e   : > { %1853 = vpow2.f32 %v515_v13 }
 0x281   : > { %v2567_v3 = vpop.trf.xlu1 }
 0x282   : > { %v730_v9 = vsub.f32 0.0, %v2567_v3 }
 0x284   : > { %v732_v30 = vand.u32 2147483647, %v730_v9  ;;  %v731_v6 = vmin.f32 %v730_v9, 0.0 }
 0x286   : > { %v733_v26 = vsub.f32 0.0, %v732_v30 }
 0x288   : > { %v734_v15 = vmul.f32 1.442695, %v733_v26 }
 0x28a   : > { %1855 = vpow2.f32 %v734_v15 }
 0x28b   : > { %v1854_v28 = vpop.eup %1853 }
 0x28c   : > { %v517_v35 = vadd.f32 1.0, %v1854_v28  ;;  %v520_v39 = vmul.f32 -0.5, %v1854_v28  ;;  %v523_v48 = vand.u32 2147483647, %v1854_v28 }
 0x28e   : > { %v521_v44 = vadd.f32 1.0, %v520_v39  ;;  %vm2594_vm10 = vcmp.lt.f32.partialorder %v523_v48, 0.0004427343 }
 0x290   : > { %v522_v56 = vmul.f32 %v1854_v28, %v521_v44 }
 0x297   : > { %v1856_v8 = vpop.eup %1855 }
 0x298   : > { %v736_v37 = vadd.f32 1.0, %v1856_v8  ;;  %v739_v36 = vmul.f32 -0.5, %v1856_v8  ;;  %v742_v47 = vand.u32 2147483647, %v1856_v8 }
 0x29a   : > { %v740_v43 = vadd.f32 1.0, %v739_v36  ;;  %vm2590_vm9 = vcmp.lt.f32.partialorder %v742_v47, 0.0004427343 }
 0x29c   : > { %v741_v54 = vmul.f32 %v1856_v8, %v740_v43 }
 0x2c3   : > { %v2572_v10 = vpop.trf.xlu0 }
 0x2c4   : > { %v1014_v14 = vsub.f32 0.0, %v2572_v10 }
 0x2c6   : > { %v1016_v12 = vand.u32 2147483647, %v1014_v14  ;;  %v1015_v3 = vmin.f32 %v1014_v14, 0.0 }
 0x2c8   : > { %v1017_v18 = vsub.f32 0.0, %v1016_v12 }
 0x2ca   : > { %v1018_v16 = vmul.f32 1.442695, %v1017_v18 }
 0x2cc   : > { %1857 = vpow2.f32 %v1018_v16 }
 0x2d3   : > { %v2580_v24 = vpop.trf.xlu1 }
 0x2d4   : > { %v1290_v17 = vsub.f32 0.0, %v2580_v24 }
 0x2d6   : > { %v1292_v20 = vand.u32 2147483647, %v1290_v17  ;;  %v1291_v13 = vmin.f32 %v1290_v17, 0.0 }
 0x2d8   : > { %v1293_v33 = vsub.f32 0.0, %v1292_v20 }
 0x2d9   : > { %v1858_v32 = vpop.eup %1857 }
 0x2da   : > { %v1294_v22 = vmul.f32 1.442695, %v1293_v33  ;;  %v1020_v11 = vadd.f32 1.0, %v1858_v32  ;;  %v1023_v40 = vmul.f32 -0.5, %v1858_v32  ;;  %v1026_v52 = vand.u32 2147483647, %v1858_v32 }
 0x2db   : > { %v2585_v23 = vpop.trf.xlu0 }
 0x2dc   : > { %v1566_v27 = vsub.f32 0.0, %v2585_v23  ;;  %1859 = vpow2.f32 %v1294_v22  ;;  %v1024_v49 = vadd.f32 1.0, %v1023_v40  ;;  %vm1027_vm11 = vcmp.lt.f32.partialorder %v1026_v52, 0.0004427343 }
 0x2de   : > { %v1568_v29 = vand.u32 2147483647, %v1566_v27  ;;  %v1025_v60 = vmul.f32 %v1858_v32, %v1024_v49  ;;  %v1567_v8 = vmin.f32 %v1566_v27, 0.0 }
 0x2e0   : > { %v1569_v31 = vsub.f32 0.0, %v1568_v29 }
 0x2e2   : > { %v1570_v38 = vmul.f32 1.442695, %v1569_v31 }
 0x2e4   : > { %1861 = vpow2.f32 %v1570_v38 }
 0x2e5   : > { %1863 = vlog2.f32 %v517_v35 }
 0x2e6   : > { %1865 = vlog2.f32 %v736_v37 }
 0x2e7   : > { %1867 = vlog2.f32 %v1020_v11 }
 0x2e9   : > { %v1860_v19 = vpop.eup %1859 }
 0x2ea   : > { %v1296_v25 = vadd.f32 1.0, %v1860_v19  ;;  %v1299_v50 = vmul.f32 -0.5, %v1860_v19  ;;  %v1302_v0 = vand.u32 2147483647, %v1860_v19 }
 0x2ec   : > { %1869 = vlog2.f32 %v1296_v25  ;;  %v1300_v61 = vadd.f32 1.0, %v1299_v50  ;;  %vm1303_vm12 = vcmp.lt.f32.partialorder %v1302_v0, 0.0004427343 }
 0x2ee   : > { %v1301_v12 = vmul.f32 %v1860_v19, %v1300_v61 }
 0x2f1   : > { %v1862_v41 = vpop.eup %1861 }
 0x2f2   : > { %v1864_v42 = vpop.eup %1863  ;;  %v1572_v45 = vadd.f32 1.0, %v1862_v41  ;;  %v1575_v2 = vmul.f32 -0.5, %v1862_v41  ;;  %v1578_v15 = vand.u32 2147483647, %v1862_v41 }
 0x2f3   : > { %v1866_v46 = vpop.eup %1865  ;;  %v519_v55 = vmul.f32 0.6931472, %v1864_v42 }
 0x2f4   : > { %1871 = vlog2.f32 %v1572_v45  ;;  %v1868_v51 = vpop.eup %1867  ;;  %v738_v53 = vmul.f32 0.6931472, %v1866_v46  ;;  %v1576_v9 = vadd.f32 1.0, %v1575_v2  ;;  %vm1579_vm13 = vcmp.lt.f32.partialorder %v1578_v15, 0.0004427343 }
 0x2f5   : > { %v1022_v59 = vmul.f32 0.6931472, %v1868_v51  ;;  %v525_v34 = vsel %vm2594_vm10, %v522_v56, %v519_v55 }
 0x2f6   : > { %v744_v1 = vsel %vm2590_vm9, %v741_v54, %v738_v53  ;;  %v526_v26 = vsub.f32 %v512_v63, %v525_v34  ;;  %v1577_v28 = vmul.f32 %v1862_v41, %v1576_v9 }
 0x2f7   : > { %v1028_v30 = vsel %vm1027_vm11, %v1025_v60, %v1022_v59  ;;  %v745_v62 = vsub.f32 %v731_v6, %v744_v1 }
 0x2f8   : > { %v1029_v18 = vsub.f32 %v1015_v3, %v1028_v30 }
 0x2f9   : > { %v1870_v21 = vpop.eup %1869  ;;  %v746_v20 = vadd.f32 %v745_v62, %v526_v26 }
 0x2fa   : > { %v1298_v7 = vmul.f32 0.6931472, %v1870_v21 }
 0x2fb   : > { %v1030_v29 = vadd.f32 %v1029_v18, %v746_v20 }
 0x2fc   : > { %v1304_v4 = vsel %vm1303_vm12, %v1301_v12, %v1298_v7 }
 0x2fd   : > { %v1305_v33 = vsub.f32 %v1291_v13, %v1304_v4 }
 0x2ff   : > { %v1306_v14 = vadd.f32 %v1305_v33, %v1030_v29 }
 0x301   : > { %v1872_v16 = vpop.eup %1871 }
 0x302   : > { %v1574_v22 = vmul.f32 0.6931472, %v1872_v16 }
 0x303   : > { %1590 = sbr.rel (%p1763_p8) target bundleno = 780 (0x30c), region = 52 }
 0x304   : > { %v1580_v10 = vsel %vm1579_vm13, %v1577_v28, %v1574_v22 }
 0x305   : > { %v1581_v31 = vsub.f32 %v1567_v8, %v1580_v10 }
 0x307   : > { %v1582_v32 = vadd.f32 %v1581_v31, %v1306_v14 }
 0x308   : > { %v1591_v24 = vld [vmem:[%s2227_s9] sm:$0xff] }
 0x309   : > { %v1592_v17 = vadd.f32 %v1591_v24, %v1582_v32 }
 0x30b   : > { %1594 = vst.msk [vmem:[%s2227_s9] sm:$0xff] %vm289_vm0, %v1592_v17 }
 0x30c PF: > { %p1764_p12 = scmp.le.s32.totalorder %s2565_s30, 10 }
 0x30e   : > { %1597 = sbr.rel (%p1764_p12) target bundleno = 797 (0x31d), region = 56 }
 0x313   : > { %v1598_v23 = vstv %s1762_s21  ;;  %v2053_v35 = vmov 0.0   ;;  %v1603_v38 = vld [vmem:[%s2227_s9] sm:$0xff] }
 0x314   : > { %v1599_v27 = vadd.s32 %v1598_v23, %v2231_v5 }
 0x316   : > { %vm1600_vm14 = vcmp.lt.s32.totalorder %v1599_v27, 10 }
 0x317   : > { %v1765_v37 = vsel %vm1600_vm14, 1.0, %v2053_v35 }
 0x318   : > { %v1604_v11 = vmul.f32 %v1765_v37, %v1582_v32 }
 0x31a   : > { %v1605_v19 = vadd.f32 %v1604_v11, %v1603_v38 }
 0x31c   : > { %1607 = vst.msk [vmem:[%s2227_s9] sm:$0xff] %vm289_vm0, %v1605_v19 }
 0x31d PF: > { %s1767_s28 = sshll.u32 %s2033_s15, 7  ;;  %s1622_s22 = sshll.u32 %s2227_s9, 4  ;;  %s1623_s22 = int_to_ptr.vmem [resolvable:$true] %s1622_s22 }
 0x31e   : > { %s1620_s26 = scalar_lea.hbm %s2666_s3, %s1767_s28  ;;  %s1609_s1 = scalar_lea.sflag [#allocation4], %s2214_s20 }
 0x31f   : > { %s1957_s23 = scalar_lea.vmem %s1623_s22, 128  ;;  %s2054_s6 = smov [#allocation8]  }
 0x320   : > { %p1958_p0 = scmp.ne.s32.totalorder %s1623_s22, %s1957_s23  ;;  %s1961_s8 = sshll.u32 %s2054_s6, 4  ;;  %s1962_s8 = int_to_ptr.vmem [resolvable:$false] %s1961_s8 }
 0x321   : > { %s1963_s4 = scalar_lea.vmem %s1962_s8, 256  ;;  %p1964_p2 = scmp.lt.s32.totalorder %s1623_s22, %s1962_s8 }
 0x322   : > { %p1959_p1 = pnand %p1958_p0, %p2130_p9  ;;  %p1965_p4 = scmp.lt.s32.totalorder %s1963_s4, %s1957_s23 }
 0x324   : > { %p1960_p3 = pneg %p1959_p1  ;;  %p1966_p5 = por %p1965_p4, %p1964_p2 }
 0x326   : > { %p1967_p7 = pnand %p1966_p5, %p1960_p3 }
 0x328   : > { %1970 = shalt.err (!%p1967_p7)
}
 0x329   : > { %s1971_s15 = scalar_lea.hbm %s1620_s26, 128  ;;  %s1975_s7 = scalar_lea.hbm %s2666_s3, 256 }
 0x32a   : > { %p1972_p6 = scmp.ne.s32.totalorder %s1620_s26, %s1971_s15  ;;  %p1976_p8 = scmp.lt.s32.totalorder %s1620_s26, %s2666_s3 }
 0x32b   : > { %p1977_p12 = scmp.lt.s32.totalorder %s1975_s7, %s1971_s15 }
 0x32c   : > { %p1973_p10 = pnand %p1972_p6, %p2130_p9 }
 0x32d   : > { %p1978_p0 = por %p1977_p12, %p1976_p8 }
 0x32e   : > { %p1974_p13 = pneg %p1973_p10 }
 0x330   : > { %p1979_p1 = pnand %p1978_p0, %p1974_p13 }
 0x332   : > { %1982 = shalt.err (!%p1979_p1)
}
 0x333   : > { %1777 = dma.vmem_to_hbm [thread:$0]  (%p2130_p9), %s1623_s22, 128, %s1620_s26, %s1609_s1  }
 0x334 PF: > { %s1634_s24 = sand.u32 1, %s2021_s12   ;;  %p2684_p3 = scmp.ge.s32.totalorder %s2041_s17, 2 }
 0x335   : > { %s1635_s10 = scalar_lea.sflag [#allocation4], %s1634_s24 }
 0x336   : > { %p1790_p2 = pnand %p2684_p3, %p2137_p11 }
 0x338   : > { %p1791_p4 = pneg %p1790_p2 }
 0x33a   : > { %2016 = dma.done.wait (%p1791_p4), %s1635_s10, 128  }
 0x33b   : > { %2018 = vsyncadd (%p1791_p4), %s1635_s10, 4294967168  ;;  %s22_s17 = sadd.s32 1, %s2041_s17   ;;  %s2685_s11 = sld [smem:[#allocation12_spill]] }
 0x33c   : > { %p19_p5 = scmp.ge.s32.totalorder %s22_s17, 4   ;;  %s2686_s14 = sld [smem:[#allocation14_spill]] }
 0x33d   : > { %s2687_s25 = sld [smem:[#allocation13_spill]]  ;;  %s2688_s12 = smov %s2025_s13 }
 0x33e   : > { %s2690_s15 = smov %s2037_s16 }
 0x33f   :  { %21 = sbr.rel (!%p19_p5) target bundleno = 10 (0xa), region = 113 }
 0x341   : > { %s2689_s13 = smov %s2685_s11 }
 0x343   : > { %s2691_s16 = smov %s2687_s25 }
 0x344   :  { %1640 = vsyncpa [#allocation3], 1 }
 0x345   :  { %1642 = vsyncpa [#allocation3 + $0x1], 1 }
 0x346   :  { %1643 = vsyncpa [#allocation6], 1 }
 0x347   :  { %1645 = vsyncpa [#allocation6 + $0x1], 1 }
 0x348   :  { %1646 = vsyncpa [#allocation4], 1 }
 0x349   :  { %1648 = vsyncpa [#allocation4 + $0x1], 1 }

</bundles_post_ra>
